<compile_context>
chip_gen: v7x
topology: tpu7x:2x2x1
jax: 0.10.0
libtpu: 0.0.40
codegen_flags: <defaults>
</compile_context>

<pallas_src>
import functools

import jax
import jax.numpy as jnp
from jax.experimental import pallas as pl
from jax.experimental.pallas import tpu as pltpu


def _round_up(x, m):
    return ((x + m - 1) // m) * m


# --------------------------- chip introspection -----------------------------

def _chip_traits():
    """(has_bf16_vpu, num_tensorcores) from the device kind, best effort."""
    try:
        kind = jax.devices()[0].device_kind.lower()
    except Exception:
        kind = ""
    bf16_vpu = any(t in kind for t in ("v6", "v7", "7x"))
    multi_tc = any(t in kind for t in ("v4", "v5p", "v7", "7x"))
    return bf16_vpu, (2 if multi_tc else 1)


def _vmem_limit_bytes():
    """~80% of physical per-core VMEM (headroom for compiler scratch)."""
    cap = None
    try:
        info = pltpu.get_tpu_info()
        cap = getattr(info, "vmem_capacity_bytes", None)
    except Exception:
        cap = None
    if not cap:
        cap = 128 * 1024 * 1024
    return int(cap * 0.8)


def _pick_tile_b(B, din_p, h_p, dout_p, out_bytes, vmem_budget, num_tc):
    """Largest batch tile (multiple of 8, <=2048) that fits the VMEM budget."""
    # Constant-index weight/bias blocks (double-buffered by the pipeline).
    fixed = 2 * 2 * (din_p * h_p + h_p * dout_p) + 2 * 4 * (h_p + dout_p)
    # Per-row bytes: double-buffered bf16 x tile + double-buffered out tile,
    # plus the f32 hidden/accumulator intermediates live during compute.
    per_row = (2 * 2 * din_p + 2 * out_bytes * dout_p
               + 4 * h_p + 2 * h_p + 4 * dout_p)
    avail = max(vmem_budget - fixed, per_row * 8)
    cap = max(8, (avail // per_row) // 8 * 8)
    tile_b = min(2048, cap, _round_up(B, 8))
    # Keep >= num_tc grid steps on multi-TensorCore chips (v7x) so the
    # "parallel" batch axis can shard across cores.
    if num_tc > 1 and B >= 8 * num_tc:
        tile_b = min(tile_b, _round_up(pl.cdiv(B, num_tc), 8))
    return max(8, (tile_b // 8) * 8)


# ----------------------------- Pallas kernel --------------------------------

def _dnn_kernel(x_ref, w1_ref, b1_ref, w2_ref, b2_ref, o_ref, *, bf16_epilogue):
    """Fused: Linear(+folded BN) -> LeakyReLU -> (Dropout=id) -> Linear."""
    x = x_ref[...]                                           # bf16 (TB, Din_p)

    # Layer 1: spectral-normalized linear with eval-mode BN folded in.
    h = jnp.dot(x, w1_ref[...], preferred_element_type=jnp.float32)

    if bf16_epilogue:
        # v6e/v7x: bf16 VALU -> halve the epilogue passes over the (TB,H) tile.
        h = h.astype(jnp.bfloat16) + b1_ref[...]             # bf16 bias add
        h = jnp.maximum(h, h * 0.01)                         # LeakyReLU(0.01)
    else:
        # v5e: no bf16 VALU; keep the f32 epilogue (kernel is MXU-bound there).
        h = h + b1_ref[...]
        h = jnp.maximum(h, h * 0.01)
        h = h.astype(jnp.bfloat16)

    # Dropout(0.5) is identity in eval mode.
    # TODO(synk): training-mode semantics (batch-stat BatchNorm, stochastic
    # Dropout) are not reproduced; this kernel implements eval-mode forward.

    # Layer 2: spectral-normalized linear (bf16 operands, f32 MXU accumulate).
    out = jnp.dot(h, w2_ref[...], preferred_element_type=jnp.float32)
    out = out + b2_ref[...]                                  # f32 (TB, Dout_p)
    o_ref[...] = out.astype(o_ref.dtype)


def dnn_forward(x, params, *, tile_b=None, out_dtype=jnp.float32):
    """Run the fused DNN forward pass with Pallas.

    x: (B, d_in) float32.
    params: dict from make_params (BN-folded, 128-padded, bf16 weights).
    out_dtype: jnp.float32 (PyTorch-faithful) or jnp.bfloat16 (halves output
      HBM traffic when the caller can accept it).
    """
    w1, b1, w2, b2 = params["w1"], params["b1"], params["w2"], params["b2"]
    d_in, d_out = params["d_in"], params["d_out"]

    B, xin = x.shape
    assert xin == d_in, "input feature size mismatch"
    din_p, h_p = w1.shape
    dout_p = w2.shape[1]

    bf16_vpu, num_tc = _chip_traits()
    vmem_limit = _vmem_limit_bytes()
    out_bytes = jnp.dtype(out_dtype).itemsize

    if tile_b is None:
        tile_b = _pick_tile_b(B, din_p, h_p, dout_p, out_bytes,
                              int(vmem_limit * 0.75), num_tc)
    assert tile_b % 8 == 0

    # No batch padding: ragged final tile is masked on the output store by the
    # Pallas pipeline; garbage rows read in the final x block never reach the
    # first B output rows.
    grid = (pl.cdiv(B, tile_b),)

    # Single fused cast + feature-pad of the activations (no zeros +
    # dynamic_update_slice pass over HBM).
    xb = x.astype(jnp.bfloat16)
    if din_p != d_in:
        xb = jnp.pad(xb, ((0, 0), (0, din_p - d_in)))

    # Bias dtype follows the epilogue dtype.
    b1_in = b1.astype(jnp.bfloat16) if bf16_vpu else b1

    bcast = lambda shape: pl.BlockSpec(shape, lambda i: (0, 0))
    # TODO(synk): on v7x the constant-index weight/bias blocks could be
    # single-buffered (pipeline_mode=pl.Buffered(1)) to reclaim the dead
    # second pipeline buffer inside the 64 MiB VMEM budget.

    flops = 2 * B * (din_p * h_p + h_p * dout_p)
    bytes_accessed = (xb.size * 2 + w1.size * 2 + w2.size * 2
                      + b1_in.size * b1_in.dtype.itemsize + b2.size * 4
                      + B * dout_p * out_bytes)

    kernel = functools.partial(_dnn_kernel, bf16_epilogue=bf16_vpu)

    out = pl.pallas_call(
        kernel,
        out_shape=jax.ShapeDtypeStruct((B, dout_p), out_dtype),
        grid_spec=pltpu.PrefetchScalarGridSpec(
            num_scalar_prefetch=0,
            grid=grid,
            in_specs=[
                pl.BlockSpec((tile_b, din_p), lambda i: (i, 0)),   # x tile
                bcast((din_p, h_p)),                               # w1 (folded)
                bcast((1, h_p)),                                   # b1 (folded)
                bcast((h_p, dout_p)),                              # w2
                bcast((1, dout_p)),                                # b2
            ],
            out_specs=pl.BlockSpec((tile_b, dout_p), lambda i: (i, 0)),
        ),
        compiler_params=pltpu.CompilerParams(
            dimension_semantics=("parallel",),
            vmem_limit_bytes=int(vmem_limit)),
        cost_estimate=pl.CostEstimate(
            flops=int(flops), transcendentals=0,
            bytes_accessed=int(bytes_accessed)),
    )(xb, w1, b1_in, w2, b2)

    return out[:, :d_out]


# ------------------------- parameter construction ---------------------------

def _spectral_normalize(w, key, n_iters=20, eps=1e-12):
    """Divide w (out_features, in_features) by its largest singular value.

    Mirrors torch.nn.utils.spectral_norm power iteration (deterministic seed).
    """
    out_f, _ = w.shape
    u = jax.random.normal(key, (out_f,), dtype=w.dtype)
    u = u / (jnp.linalg.norm(u) + eps)

    def body(_, carry):
        u, _ = carry
        v = w.T @ u
        v = v / (jnp.linalg.norm(v) + eps)
        u_new = w @ v
        u_new = u_new / (jnp.linalg.norm(u_new) + eps)
        return (u_new, v)

    u, v = jax.lax.fori_loop(0, n_iters, body,
                             (u, jnp.zeros((w.shape[1],), w.dtype)))
    sigma = u @ (w @ v)
    return w / sigma


def make_params(key, input_size, hidden_size, output_size, eps_bn=1e-5):
    """Deterministic init; folds eval-mode BN into layer 1 and pads to 128."""
    k = jax.random.split(key, 6)

    # nn.Linear-style init (uniform in +-1/sqrt(fan_in)); shapes (out, in).
    lim1 = 1.0 / jnp.sqrt(jnp.float32(input_size))
    w1_oi = jax.random.uniform(k[0], (hidden_size, input_size), jnp.float32,
                               -lim1, lim1)
    b1 = jax.random.uniform(k[1], (hidden_size,), jnp.float32, -lim1, lim1)

    lim2 = 1.0 / jnp.sqrt(jnp.float32(hidden_size))
    w2_oi = jax.random.uniform(k[2], (output_size, hidden_size), jnp.float32,
                               -lim2, lim2)
    b2 = jax.random.uniform(k[3], (output_size,), jnp.float32, -lim2, lim2)

    # Spectral normalization (preprocessing, plain JAX).
    # TODO(synk): a trained torch checkpoint would supply its accumulated `u`
    # vector; here a fresh 20-step power iteration is used instead.
    w1_oi = _spectral_normalize(w1_oi, k[4])
    w2_oi = _spectral_normalize(w2_oi, k[5])

    # BatchNorm1d fresh-init params / running stats (eval mode).
    gamma = jnp.ones((hidden_size,), jnp.float32)
    beta = jnp.zeros((hidden_size,), jnp.float32)
    rm = jnp.zeros((hidden_size,), jnp.float32)
    rv = jnp.ones((hidden_size,), jnp.float32)

    w1 = w1_oi.T                                    # (in, hidden) for x @ W
    w2 = w2_oi.T                                    # (hidden, out)

    # Fold eval-mode BatchNorm affine into the first linear (exact).
    scale = gamma * jax.lax.rsqrt(rv + eps_bn)      # (hidden,)
    w1_f = w1 * scale[None, :]
    b1_f = (b1 - rm) * scale + beta

    # Zero-pad every feature dim to a multiple of 128 lanes. Zero padding is
    # exact: padded hidden units are 0 -> LeakyReLU(0)=0 -> zero w2 rows.
    din_p = _round_up(input_size, 128)
    h_p = _round_up(hidden_size, 128)
    dout_p = _round_up(output_size, 128)

    w1_p = jnp.zeros((din_p, h_p), jnp.float32).at[:input_size, :hidden_size].set(w1_f)
    b1_p = jnp.zeros((1, h_p), jnp.float32).at[0, :hidden_size].set(b1_f)
    w2_p = jnp.zeros((h_p, dout_p), jnp.float32).at[:hidden_size, :output_size].set(w2)
    b2_p = jnp.zeros((1, dout_p), jnp.float32).at[0, :output_size].set(b2)

    kernel_params = {
        "w1": w1_p.astype(jnp.bfloat16),   # bf16 matmul operands
        "b1": b1_p,                        # f32 (wrapper casts per epilogue mode)
        "w2": w2_p.astype(jnp.bfloat16),
        "b2": b2_p,
        "d_in": input_size,
        "d_out": output_size,
    }
    ref_params = {
        "w1": w1, "b1": b1, "gamma": gamma, "beta": beta, "rm": rm, "rv": rv,
        "w2": w2, "b2": b2,
    }
    return kernel_params, ref_params


# -------------------------------- references ---------------------------------

def reference_forward_f32(x, p, eps_bn=1e-5):
    """Pure-JAX f32 reference of the original eval-mode forward (unfolded BN)."""
    h = x @ p["w1"] + p["b1"]
    h = (h - p["rm"]) / jnp.sqrt(p["rv"] + eps_bn) * p["gamma"] + p["beta"]
    h = jnp.where(h > 0, h, 0.01 * h)
    return h @ p["w2"] + p["b2"]


def reference_forward_bf16(x, kp, *, bf16_epilogue, out_dtype=jnp.float32):
    """Pure-JAX reference with the same bf16/padded numerics as the kernel."""
    d_in = kp["d_in"]
    din_p = kp["w1"].shape[0]
    xb = x.astype(jnp.bfloat16)
    if din_p != d_in:
        xb = jnp.pad(xb, ((0, 0), (0, din_p - d_in)))
    h = jnp.dot(xb, kp["w1"], preferred_element_type=jnp.float32)
    if bf16_epilogue:
        h = h.astype(jnp.bfloat16) + kp["b1"].astype(jnp.bfloat16)
        h = jnp.maximum(h, h * 0.01)
    else:
        h = h + kp["b1"]
        h = jnp.maximum(h, h * 0.01)
        h = h.astype(jnp.bfloat16)
    out = jnp.dot(h, kp["w2"], preferred_element_type=jnp.float32) + kp["b2"]
    return out[:, :kp["d_out"]].astype(out_dtype)


# ----------------------------------- main ------------------------------------

if __name__ == "__main__":
    key = jax.random.PRNGKey(0)
    k_x, k_p = jax.random.split(key)

    batch = 16
    input_size = 32
    hidden_size = 64      # small stand-in for block_sizes=[1000]
    output_size = 8

    x = jax.random.normal(k_x, (batch, input_size), dtype=jnp.float32)
    kernel_params, ref_params = make_params(k_p, input_size, hidden_size,
                                            output_size)

    out = dnn_forward(x, kernel_params)
    out = jax.block_until_ready(out)
    assert out.shape == (batch, output_size)
    assert out.dtype == jnp.float32

    # Tight check vs a JAX reference with identical bf16/epilogue numerics.
    bf16_vpu, _ = _chip_traits()
    ref_bf16 = reference_forward_bf16(x, kernel_params, bf16_epilogue=bf16_vpu)
    assert jnp.allclose(out, ref_bf16, atol=5e-3, rtol=5e-3), \
        "mismatch vs bf16 reference"

    # Loose check vs full-f32 eval-mode reference (unfolded BN, unpadded);
    # tolerance accounts for the bf16 matmul operands / epilogue.
    ref_f32 = reference_forward_f32(x, ref_params)
    assert jnp.allclose(out, ref_f32, atol=5e-2, rtol=5e-2), \
        "mismatch vs f32 reference"

    # Exercise the reduced-HBM-traffic bf16 output path as well.
    out_bf16 = jax.block_until_ready(
        dnn_forward(x, kernel_params, out_dtype=jnp.bfloat16))
    assert out_bf16.dtype == jnp.bfloat16
    assert jnp.allclose(out_bf16.astype(jnp.float32), out, atol=2e-2, rtol=2e-2)

    print("KERNEL_OK")
</pallas_src>

<mosaic_0001>
module attributes {stable_mosaic.version = 11 : i64} {
  func.func @_dnn_kernel(%arg0: i32, %arg1: memref<16x128xbf16, #tpu.memory_space<vmem>>, %arg2: memref<128x128xbf16, #tpu.memory_space<vmem>>, %arg3: memref<1x128xf32, #tpu.memory_space<vmem>>, %arg4: memref<128x128xbf16, #tpu.memory_space<vmem>>, %arg5: memref<1x128xf32, #tpu.memory_space<vmem>>, %arg6: memref<16x128xf32, #tpu.memory_space<vmem>>) attributes {dimension_semantics = [#tpu.dimension_semantics<parallel>], iteration_bounds = array<i64: 1>, scalar_prefetch = 0 : i64, scratch_operands = 0 : i64, tpu.core_type = #tpu.core_type<tc>, window_params = [{transform_indices = @transform_0, window_bounds = array<i64: 16, 128>}, {pipeline_mode = #tpu.pipeline_mode<synchronous>, transform_indices = @transform_1, window_bounds = array<i64: 128, 128>}, {pipeline_mode = #tpu.pipeline_mode<synchronous>, transform_indices = @transform_2, window_bounds = array<i64: 1, 128>}, {pipeline_mode = #tpu.pipeline_mode<synchronous>, transform_indices = @transform_3, window_bounds = array<i64: 128, 128>}, {pipeline_mode = #tpu.pipeline_mode<synchronous>, transform_indices = @transform_4, window_bounds = array<i64: 1, 128>}, {transform_indices = @transform_5, window_bounds = array<i64: 16, 128>}]} {
    %c0 = arith.constant 0 : index
    %c0_0 = arith.constant 0 : index
    %0 = vector.load %arg1[%c0, %c0_0] : memref<16x128xbf16, #tpu.memory_space<vmem>>, vector<16x128xbf16>
    %c0_1 = arith.constant 0 : index
    %c0_2 = arith.constant 0 : index
    %1 = vector.load %arg2[%c0_1, %c0_2] : memref<128x128xbf16, #tpu.memory_space<vmem>>, vector<128x128xbf16>
    %cst = arith.constant dense<0.000000e+00> : vector<16x128xf32>
    %2 = tpu.matmul %0, %1, %cst {dimension_numbers = #tpu.dot_dimension_numbers<[1], [0], [0], [1], [0, 0, 1, 1], [], []>} : vector<16x128xbf16>, vector<128x128xbf16>, vector<16x128xf32> -> vector<16x128xf32>
    %c0_3 = arith.constant 0 : index
    %c0_4 = arith.constant 0 : index
    %3 = vector.load %arg3[%c0_3, %c0_4] : memref<1x128xf32, #tpu.memory_space<vmem>>, vector<1x128xf32>
    %4 = vector.broadcast %3 : vector<1x128xf32> to vector<16x128xf32>
    %5 = arith.addf %2, %4 : vector<16x128xf32>
    %cst_5 = arith.constant 0.00999999977 : f32
    %6 = vector.broadcast %cst_5 : f32 to vector<16x128xf32>
    %7 = arith.mulf %5, %6 : vector<16x128xf32>
    %8 = arith.maximumf %5, %7 : vector<16x128xf32>
    %9 = arith.truncf %8 : vector<16x128xf32> to vector<16x128xbf16>
    %c0_6 = arith.constant 0 : index
    %c0_7 = arith.constant 0 : index
    %10 = vector.load %arg4[%c0_6, %c0_7] : memref<128x128xbf16, #tpu.memory_space<vmem>>, vector<128x128xbf16>
    %cst_8 = arith.constant dense<0.000000e+00> : vector<16x128xf32>
    %11 = tpu.matmul %9, %10, %cst_8 {dimension_numbers = #tpu.dot_dimension_numbers<[1], [0], [0], [1], [0, 0, 1, 1], [], []>} : vector<16x128xbf16>, vector<128x128xbf16>, vector<16x128xf32> -> vector<16x128xf32>
    %c0_9 = arith.constant 0 : index
    %c0_10 = arith.constant 0 : index
    %12 = vector.load %arg5[%c0_9, %c0_10] : memref<1x128xf32, #tpu.memory_space<vmem>>, vector<1x128xf32>
    %13 = vector.broadcast %12 : vector<1x128xf32> to vector<16x128xf32>
    %14 = arith.addf %11, %13 : vector<16x128xf32>
    %c0_11 = arith.constant 0 : index
    %c0_12 = arith.constant 0 : index
    %15 = vector.load %arg6[%c0_11, %c0_12] : memref<16x128xf32, #tpu.memory_space<vmem>>, vector<16x128xf32>
    tpu.vector_store %arg6[%c0_11, %c0_12], %14 {strides = array<i32>} : memref<16x128xf32, #tpu.memory_space<vmem>>, vector<16x128xf32>,
    return
  }
  func.func @transform_0(%arg0: i32) -> (i32, i32) {
    %c0_i32 = arith.constant 0 : i32
    %c0_i32_0 = arith.constant 0 : i32
    return %arg0, %c0_i32 : i32, i32
  }
  func.func @transform_1(%arg0: i32) -> (i32, i32) {
    %c0_i32 = arith.constant 0 : i32
    %c0_i32_0 = arith.constant 0 : i32
    %c0_i32_1 = arith.constant 0 : i32
    return %c0_i32, %c0_i32_0 : i32, i32
  }
  func.func @transform_2(%arg0: i32) -> (i32, i32) {
    %c0_i32 = arith.constant 0 : i32
    %c0_i32_0 = arith.constant 0 : i32
    %c0_i32_1 = arith.constant 0 : i32
    return %c0_i32, %c0_i32_0 : i32, i32
  }
  func.func @transform_3(%arg0: i32) -> (i32, i32) {
    %c0_i32 = arith.constant 0 : i32
    %c0_i32_0 = arith.constant 0 : i32
    %c0_i32_1 = arith.constant 0 : i32
    return %c0_i32, %c0_i32_0 : i32, i32
  }
  func.func @transform_4(%arg0: i32) -> (i32, i32) {
    %c0_i32 = arith.constant 0 : i32
    %c0_i32_0 = arith.constant 0 : i32
    %c0_i32_1 = arith.constant 0 : i32
    return %c0_i32, %c0_i32_0 : i32, i32
  }
  func.func @transform_5(%arg0: i32) -> (i32, i32) {
    %c0_i32 = arith.constant 0 : i32
    %c0_i32_0 = arith.constant 0 : i32
    return %arg0, %c0_i32 : i32, i32
  }
}

</mosaic_0001>

<bundles_post_ra>
// kernel: tpu_custom_call.1
= control target key start
LH: loop header
LB: loop body
LE: loop exit
PB: predicated region body
PF: predicated region fallthrough
CT: control target
= control target key end

     0   :  { %10 = vsyncpa [#allocation3], 0  ;;  %s720_s0 = inlined_call_operand.hbm [shape: bf16[16,128], index: 0, kind: input, shape index: {}]   ;;  %s721_s1 = inlined_call_operand.hbm [shape: bf16[128,128], index: 1, kind: input, shape index: {}]   ;;  %s722_s2 = inlined_call_operand.hbm [shape: f32[1,128], index: 2, kind: input, shape index: {}]   ;;  %s723_s3 = inlined_call_operand.hbm [shape: bf16[128,128], index: 3, kind: input, shape index: {}]   ;;  %s724_s4 = inlined_call_operand.hbm [shape: f32[1,128], index: 4, kind: input, shape index: {}]   ;;  %s725_s5 = inlined_call_operand.hbm [shape: f32[16,128], index: 5, kind: output, shape index: {}]  }
   0x1   :  { %11 = vsyncpa [#allocation6], 0 }
   0x2   :  { %12 = vsyncpa [#allocation9], 0 }
   0x3   :  { %13 = vsyncpa [#allocation4], 0  ;;  %s590_s18 = smov [#allocation5]   ;;  %s591_s20 = smov [#allocation8]  }
   0x4   :  { %s31_s19 = sshll.u32 %s590_s18, 4  ;;  %s53_s21 = sshll.u32 %s591_s20, 4  ;;  %s32_s19 = int_to_ptr.vmem [resolvable:$true] %s31_s19  ;;  %s632_s21 = int_to_ptr.vmem [resolvable:$true] %s53_s21 }
   0x5   :  { %s450_s24 = scalar_lea.hbm %s721_s1, 1024 }
   0x6   :  { %p451_p0 = scmp.ne.s32.totalorder %s721_s1, %s450_s24  ;;  %p454_p1 = scmp.lt.u32.totalorder %s450_s24, %s721_s1 }
   0x8   :  { %p456_p2 = pnand %p454_p1, %p451_p0 }
   0xa   :  { %459 = shalt.err (!%p456_p2)
}
   0xb   :  { %s460_s29 = scalar_lea.vmem %s32_s19, 1024  ;;  %p465_p4 = scmp.lt.s32.totalorder %s32_s19, %s32_s19 }
   0xc   :  { %p461_p3 = scmp.ne.s32.totalorder %s32_s19, %s460_s29  ;;  %p466_p5 = scmp.lt.s32.totalorder %s460_s29, %s460_s29 }
   0xe   :  { %p467_p6 = por %p466_p5, %p465_p4 }
  0x10   :  { %p468_p7 = pnand %p467_p6, %p461_p3 }
  0x12   :  { %471 = shalt.err (!%p468_p7)
}
  0x13   :  { %s592_s30 = smov 64   ;;  %s593_s6 = smov 4  }
  0x14   :  { %37 = dma.hbm_to_vmem [thread:$0]  %s721_s1, 1024, %s32_s19, [#allocation6], %s592_s30, %s592_s30, %s593_s6  }
  0x15   :  { %s472_s11 = scalar_lea.hbm %s723_s3, 1024 }
  0x16   :  { %p473_p8 = scmp.ne.s32.totalorder %s723_s3, %s472_s11  ;;  %p476_p9 = scmp.lt.u32.totalorder %s472_s11, %s723_s3 }
  0x18   :  { %p478_p10 = pnand %p476_p9, %p473_p8 }
  0x1a   :  { %481 = shalt.err (!%p478_p10)
}
  0x1b   :  { %s482_s16 = scalar_lea.vmem %s632_s21, 1024  ;;  %p487_p12 = scmp.lt.s32.totalorder %s632_s21, %s632_s21 }
  0x1c   :  { %p483_p11 = scmp.ne.s32.totalorder %s632_s21, %s482_s16  ;;  %p488_p13 = scmp.lt.s32.totalorder %s482_s16, %s482_s16 }
  0x1e   :  { %p489_p0 = por %p488_p13, %p487_p12 }
  0x20   :  { %p490_p1 = pnand %p489_p0, %p483_p11 }
  0x22   :  { %493 = shalt.err (!%p490_p1)
}
  0x23   :  { %59 = dma.hbm_to_vmem [thread:$0]  %s723_s3, 1024, %s632_s21, [#allocation9], %s592_s30, %s592_s30, %s593_s6  }
  0x24   :  { %s594_s18 = smov [#allocation2]   ;;  %s595_s20 = smov [#allocation7]  }
  0x25   :  { %s19_s19 = sshll.u32 %s594_s18, 4  ;;  %s44_s22 = sshll.u32 %s595_s20, 4  ;;  %s20_s19 = int_to_ptr.vmem [resolvable:$true] %s19_s19  ;;  %s45_s22 = int_to_ptr.vmem [resolvable:$true] %s44_s22 }
  0x26   :  { %s494_s25 = scalar_lea.hbm %s720_s0, 128 }
  0x27   :  { %p495_p2 = scmp.ne.s32.totalorder %s720_s0, %s494_s25  ;;  %p498_p3 = scmp.lt.u32.totalorder %s494_s25, %s720_s0 }
  0x29   :  { %p500_p4 = pnand %p498_p3, %p495_p2 }
  0x2b   :  { %503 = shalt.err (!%p500_p4)
}
  0x2c   :  { %s504_s3 = scalar_lea.vmem %s20_s19, 128  ;;  %p509_p6 = scmp.lt.s32.totalorder %s20_s19, %s20_s19 }
  0x2d   :  { %p505_p5 = scmp.ne.s32.totalorder %s20_s19, %s504_s3  ;;  %p510_p7 = scmp.lt.s32.totalorder %s504_s3, %s504_s3 }
  0x2f   :  { %p511_p8 = por %p510_p7, %p509_p6 }
  0x31   :  { %p512_p9 = pnand %p511_p8, %p505_p5 }
  0x33   :  { %515 = shalt.err (!%p512_p9)
}
  0x34   :  { %25 = dma.hbm_to_vmem [thread:$0]  %s720_s0, 128, %s20_s19, [#allocation3], %s592_s30, %s592_s30, %s593_s6  }
  0x35   :  { %s516_s10 = scalar_lea.hbm %s722_s2, 16 }
  0x36   :  { %p517_p10 = scmp.ne.s32.totalorder %s722_s2, %s516_s10  ;;  %p520_p11 = scmp.lt.u32.totalorder %s516_s10, %s722_s2 }
  0x38   :  { %p522_p12 = pnand %p520_p11, %p517_p10 }
  0x3a   :  { %525 = shalt.err (!%p522_p12)
}
  0x3b   :  { %s526_s15 = scalar_lea.vmem %s45_s22, 16  ;;  %s530_s16 = scalar_lea.vmem %s45_s22, 32 }
  0x3c   :  { %p527_p13 = scmp.ne.s32.totalorder %s45_s22, %s526_s15  ;;  %p531_p0 = scmp.lt.s32.totalorder %s45_s22, %s45_s22 }
  0x3d   :  { %p532_p1 = scmp.lt.s32.totalorder %s530_s16, %s526_s15 }
  0x3f   :  { %p533_p2 = por %p532_p1, %p531_p0 }
  0x41   :  { %p534_p3 = pnand %p533_p2, %p527_p13 }
  0x43   :  { %537 = shalt.err (!%p534_p3)
}
  0x44   :  { %47 = dma.hbm_to_vmem [thread:$0]  %s722_s2, 16, %s45_s22, [#allocation6]  }
  0x45   :  { %s596_s6 = smov [#allocation10]   ;;  %s538_s19 = scalar_lea.hbm %s724_s4, 16 }
  0x46   :  { %s66_s1 = sshll.u32 %s596_s6, 4  ;;  %p539_p4 = scmp.ne.s32.totalorder %s724_s4, %s538_s19  ;;  %s67_s1 = int_to_ptr.vmem [resolvable:$true] %s66_s1 }
  0x47   :  { %p542_p5 = scmp.lt.u32.totalorder %s538_s19, %s724_s4 }
  0x49   :  { %p544_p6 = pnand %p542_p5, %p539_p4 }
  0x4b   :  { %547 = shalt.err (!%p544_p6)
}
  0x4c   :  { %s548_s26 = scalar_lea.vmem %s67_s1, 16  ;;  %s552_s2 = scalar_lea.vmem %s67_s1, 32 }
  0x4d   :  { %p549_p7 = scmp.ne.s32.totalorder %s67_s1, %s548_s26  ;;  %p553_p8 = scmp.lt.s32.totalorder %s67_s1, %s67_s1 }
  0x4e   :  { %p554_p9 = scmp.lt.s32.totalorder %s552_s2, %s548_s26 }
  0x50   :  { %p555_p10 = por %p554_p9, %p553_p8 }
  0x52   :  { %p556_p11 = pnand %p555_p10, %p549_p7 }
  0x54   :  { %559 = shalt.err (!%p556_p11)
}
  0x55   :  { %69 = dma.hbm_to_vmem [thread:$0]  %s724_s4, 16, %s67_s1, [#allocation9]  }
  0x56   :  { %582 = dma.done.wait [#allocation3], 128  }
  0x57   :  { %583 = vsyncadd [#allocation3], 4294967168 }
  0x58   :  { %584 = dma.done.wait [#allocation6], 1040  }
  0x59   :  { %585 = vsyncadd [#allocation6], 4294966256 }
  0x5a   :  { %586 = dma.done.wait [#allocation9], 1040  }
  0x5b   :  { %587 = vsyncadd [#allocation9], 4294966256  ;;  %v597_v0 = vmov 0.0   ;;  %vm598_vm0 = vmmov 0   ;;  %v433_v1 = vld [vmem:[#allocation5] sm:$0xff]   ;;  %v434_v2 = vld [vmem:[#allocation5 + $0x8] sm:$0xff]  }
  0x5c   :  { %381 = vmatprep.subr.bf16.mxu0 %v597_v0  ;;  %397 = vmatprep.mubr.msk.bf16.mxu0 %vm598_vm0, %v597_v0  ;;  %v435_v3 = vld [vmem:[#allocation5 + $0x10] sm:$0xff]   ;;  %v442_v4 = vld [vmem:[#allocation8] sm:$0xff]   ;;  %v436_v5 = vld [vmem:[#allocation5 + $0x18] sm:$0xff]   ;;  %s599_s4 = smov [#allocation11]  }
  0x5d   :  { %401 = vmatprep.subr.bf16.mxu1 %v597_v0  ;;  %417 = vmatprep.mubr.msk.bf16.mxu1 %vm598_vm0, %v597_v0  ;;  %v443_v6 = vld [vmem:[#allocation8 + $0x8] sm:$0xff]   ;;  %v437_v7 = vld [vmem:[#allocation5 + $0x20] sm:$0xff]   ;;  %v444_v8 = vld [vmem:[#allocation8 + $0x10] sm:$0xff]   ;;  %s330_s28 = sshll.u32 %s599_s4, 4  ;;  %s331_s28 = int_to_ptr.vmem [resolvable:$true] %s330_s28 }
  0x5e   :  { %382 = vmatpush3.bf16.msra.mxu0 %v433_v1  ;;  %402 = vmatpush3.bf16.msra.mxu1 %v442_v4  ;;  %v438_v9 = vld [vmem:[#allocation5 + $0x28] sm:$0xff]   ;;  %v445_v10 = vld [vmem:[#allocation8 + $0x18] sm:$0xff]   ;;  %v439_v11 = vld [vmem:[#allocation5 + $0x30] sm:$0xff]   ;;  %s560_s29 = scalar_lea.vmem %s331_s28, 256  ;;  %p565_p13 = scmp.lt.s32.totalorder %s331_s28, %s331_s28 }
  0x5f   :  { %383 = vmatprep.subr.bf16.mxu0 %v597_v0  ;;  %403 = vmatprep.subr.bf16.mxu1 %v597_v0  ;;  %v446_v12 = vld [vmem:[#allocation8 + $0x20] sm:$0xff]   ;;  %v440_v13 = vld [vmem:[#allocation5 + $0x38] sm:$0xff]   ;;  %v447_v15 = vld [vmem:[#allocation8 + $0x28] sm:$0xff]   ;;  %p561_p12 = scmp.ne.s32.totalorder %s331_s28, %s560_s29  ;;  %p566_p0 = scmp.lt.s32.totalorder %s560_s29, %s560_s29 }
  0x60   :  { %v441_v14 = vld [vmem:[#allocation2] sm:$0xff]   ;;  %v344_v18 = vld [vmem:[#allocation7] ss:$0 sm:$0xff]  ;;  %v354_v30 = vld [vmem:[#allocation10] ss:$0 sm:$0xff] }
  0x61   :  { %v448_v16 = vld [vmem:[#allocation8 + $0x30] sm:$0xff]   ;;  %v449_v17 = vld [vmem:[#allocation8 + $0x38] sm:$0xff]   ;;  %p567_p1 = por %p566_p0, %p565_p13 }
  0x62   :  { %384 = vmatpush3.bf16.msra.mxu0 %v434_v2  ;;  %404 = vmatpush3.bf16.msra.mxu1 %v443_v6 }
  0x63   :  { %385 = vmatprep.subr.bf16.mxu0 %v597_v0  ;;  %405 = vmatprep.subr.bf16.mxu1 %v597_v0  ;;  %p568_p2 = pnand %p567_p1, %p561_p12 }
  0x66   :  { %386 = vmatpush3.bf16.msra.mxu0 %v435_v3  ;;  %406 = vmatpush3.bf16.msra.mxu1 %v444_v8 }
  0x67   :  { %387 = vmatprep.subr.bf16.mxu0 %v597_v0  ;;  %407 = vmatprep.subr.bf16.mxu1 %v597_v0 }
  0x6a   :  { %388 = vmatpush3.bf16.msra.mxu0 %v436_v5  ;;  %408 = vmatpush3.bf16.msra.mxu1 %v445_v10 }
  0x6b   :  { %389 = vmatprep.subr.bf16.mxu0 %v597_v0  ;;  %409 = vmatprep.subr.bf16.mxu1 %v597_v0 }
  0x6e   :  { %390 = vmatpush3.bf16.msra.mxu0 %v437_v7  ;;  %410 = vmatpush3.bf16.msra.mxu1 %v446_v12 }
  0x6f   :  { %391 = vmatprep.subr.bf16.mxu0 %v597_v0  ;;  %411 = vmatprep.subr.bf16.mxu1 %v597_v0 }
  0x72   :  { %392 = vmatpush3.bf16.msra.mxu0 %v438_v9  ;;  %412 = vmatpush3.bf16.msra.mxu1 %v447_v15 }
  0x73   :  { %393 = vmatprep.subr.bf16.mxu0 %v597_v0  ;;  %413 = vmatprep.subr.bf16.mxu1 %v597_v0 }
  0x76   :  { %394 = vmatpush3.bf16.msra.mxu0 %v439_v11  ;;  %414 = vmatpush3.bf16.msra.mxu1 %v448_v16 }
  0x77   :  { %395 = vmatprep.subr.bf16.mxu0 %v597_v0  ;;  %415 = vmatprep.subr.bf16.mxu1 %v597_v0 }
  0x7a   :  { %396 = vmatpush3.bf16.msra.mxu0 %v440_v13  ;;  %416 = vmatpush3.bf16.msra.mxu1 %v449_v17 }
  0x7d   :  { %398 = vmatmul.mubr.bf16.vlgmr.msra.gmra.mrb[0].mxu0 %v441_v14 }
 0x150   :  { %v199_v19 = vpop.f32.mrb[0].mxu0 }
 0x151   :  { %v200_v20 = vadd.f32 %v344_v18, %v199_v19  ;;  %v399_v21 = vpop.f32.mrb[1].mxu0 }
 0x152   :  { %v202_v22 = vpop.f32.mrb[2].mxu0 }
 0x153   :  { %v206_v23 = vmul.f32 0.01, %v200_v20  ;;  %v203_v24 = vadd.f32 %v344_v18, %v202_v22  ;;  %v400_v25 = vpop.f32.mrb[3].mxu0 }
 0x155   :  { %v207_v26 = vmul.f32 0.01, %v203_v24  ;;  %v208_v27 = vmax.f32 %v200_v20, %v206_v23 }
 0x157   :  { %v209_v28 = vmax.f32 %v203_v24, %v207_v26 }
 0x159   :  { %v210_v29 = vpack.c.bf16 %v209_v28, %v208_v27 }
 0x15b   :  { %418 = vmatmul.mubr.bf16.vlgmr.msra.gmra.mrb[0].mxu1 %v210_v29 }
 0x22e   :  { %v316_v31 = vpop.f32.mrb[0].mxu1 }
 0x22f   :  { %v317_v32 = vadd.f32 %v354_v30, %v316_v31  ;;  %v419_v33 = vpop.f32.mrb[1].mxu1 }
 0x230   :  { %v319_v34 = vpop.f32.mrb[2].mxu1 }
 0x231   :  { %323 = vst [vmem:[#allocation11] sm:$0xff] %v317_v32  ;;  %v320_v35 = vadd.f32 %v354_v30, %v319_v34  ;;  %v420_v36 = vpop.f32.mrb[3].mxu1 }
 0x233   :  { %324 = vst [vmem:[#allocation11 + $0x8] sm:$0xff] %v320_v35 }
 0x234   :  { %571 = shalt.err (!%p568_p2)
}
 0x235   :  { %s572_s7 = scalar_lea.hbm %s725_s5, 256 }
 0x236   :  { %p573_p3 = scmp.ne.s32.totalorder %s725_s5, %s572_s7  ;;  %p576_p4 = scmp.lt.u32.totalorder %s572_s7, %s725_s5 }
 0x238   :  { %p578_p5 = pnand %p576_p4, %p573_p3 }
 0x23a   :  { %581 = shalt.err (!%p578_p5)
}
 0x23b   :  { %s600_s12 = smov 128   ;;  %s601_s13 = smov 8  }
 0x23c   :  { %336 = dma.vmem_to_hbm [thread:$0]  %s331_s28, 256, %s725_s5, [#allocation4], %s600_s12, %s600_s12, %s601_s13  }
 0x23d   :  { %588 = dma.done.wait [#allocation4], 256  }
 0x23e   :  { %589 = vsyncadd [#allocation4], 4294967040 }
 0x23f   :  { %340 = vsyncpa [#allocation3], 1 }
 0x240   :  { %341 = vsyncpa [#allocation6], 1 }
 0x241   :  { %342 = vsyncpa [#allocation9], 1 }
 0x242   :  { %343 = vsyncpa [#allocation4], 1 }

</bundles_post_ra>
